<compile_context>
chip_gen: v6e
topology: v6e:2x2x1
jax: 0.10.0
libtpu: 0.0.40
codegen_flags: <defaults>
</compile_context>

<pallas_src>
import functools

import jax
import jax.numpy as jnp
from jax.experimental import pallas as pl
from jax.experimental.pallas import tpu as pltpu

# ----------------------------- hyperparameters (module __init__ args) -------
FACTUAL_LR = 0.3
COUNTERFACTUAL_LR = 0.1
TEMPERATURE = 0.5
NOVEL_VALUE = 0.0
DECAY_FACTOR = 0.05

A_PAD = 8    # actions padded to one sublane group
ROWS = 32    # packed slab rows (4 sublane groups of 8)


def _qlearning_kernel(x_ref, y_ref, *, n_actions, temperature, factual_lr,
                      counterfactual_lr, novel_value, decay_factor):
    bt = x_ref.shape[1]                      # trials in this block (lanes)
    inv_t = 1.0 / temperature

    q = x_ref[0:8, :]                        # [8, bt] (rows >= n_actions are 0)
    prob = x_ref[8:16, :]                    # [8, bt] (padded rows 0)
    urew = x_ref[16:24, :]                   # [8, bt] (padded rows 1 -> never rewarded)
    tail = x_ref[24:32, :]                   # [8, bt]
    fb = tail[0:1, :]                        # [1, bt] feedback (+1 / -1)
    uact = tail[1:2, :]                      # [1, bt] uniform for action sampling
    corr = tail[2:3, :]                      # [1, bt] correct action index (float)

    sub_i = jax.lax.broadcasted_iota(jnp.int32, (A_PAD, bt), 0)
    sub = sub_i.astype(jnp.float32)          # sublane (=action) index
    valid = sub_i < n_actions                # mask out padded action rows

    # ---- get_reward: reward_a = (u_a < p_a) * feedback -----------------------
    rewards = jnp.where(urew < prob, 1.0, 0.0) * fb            # [8, bt]

    # ---- select_action: softmax(q/T) cumulative sampling ---------------------
    # Compare unnormalized cumsum against u * sum (no divide needed).
    t = jnp.where(valid, jnp.exp(q * inv_t), 0.0)              # [8, bt]
    denom = jnp.sum(t, axis=0, keepdims=True)                  # [1, bt]
    thresh = uact * denom                                      # [1, bt]

    cum = t[0:1, :]
    count = jnp.where(cum < thresh, 1.0, 0.0)
    for j in range(1, n_actions):            # unrolled: n_actions is small & static
        cum = cum + t[j:j + 1, :]
        count = count + jnp.where(cum < thresh, 1.0, 0.0)
    action = jnp.minimum(count, float(n_actions - 1))          # [1, bt]
    accuracy = jnp.where(action == corr, 1.0, 0.0)             # [1, bt]

    # ---- compute_prediction_error: pe = reward - q ---------------------------
    pe = rewards - q                                           # [8, bt]

    # ---- update_model: factual/counterfactual LR + decay toward novel_value --
    chosen = sub == action                                     # [8, bt]
    lr = jnp.where(chosen, factual_lr, counterfactual_lr)
    q_new = q + lr * pe
    q_new = q_new + decay_factor * (novel_value - q_new)

    # ---- lane-dense, full-tile stores ----------------------------------------
    y_ref[0:8, :] = rewards
    y_ref[8:16, :] = pe
    y_ref[16:24, :] = q_new
    out_tail = (jnp.where(sub == 0.0, action, 0.0)
                + jnp.where(sub == 1.0, accuracy, 0.0))        # rows: 0=action, 1=accuracy
    y_ref[24:32, :] = out_tail


def qlearning_step(q_values, probabilities, feedback, correct_action,
                   u_reward, u_action, *, block_trials=16384,
                   temperature=TEMPERATURE, factual_lr=FACTUAL_LR,
                   counterfactual_lr=COUNTERFACTUAL_LR,
                   novel_value=NOVEL_VALUE, decay_factor=DECAY_FACTOR):
    """One 'learning' forward step for a batch of B independent trials.

    q_values, probabilities, u_reward : [B, A] float
    feedback, correct_action, u_action: [B]
    u_reward / u_action replace the python rnd.random() draws of the module.

    block_trials lanes per grid step: at the default 16384 the per-step working set is
    32*16384*4 B = 2 MiB in + 2 MiB out (~8 MiB double-buffered) — comfortably inside
    VMEM on v5e/v6e (128 MiB) and v7x (64 MiB).
    """
    B, A = q_values.shape
    assert 1 <= A <= A_PAD, "actions must fit one sublane group"

    # pad trial count to a multiple of 128 lanes and of the block size
    bpad128 = pl.cdiv(B, 128) * 128
    blk = min(block_trials, bpad128)
    blk = max(128, (blk // 128) * 128)
    bpad = pl.cdiv(bpad128, blk) * blk
    grid = (bpad // blk,)

    def rows(x, pad_val, target_rows):
        x = jnp.asarray(x, jnp.float32)
        x = jnp.pad(x, ((0, bpad - B), (0, target_rows - x.shape[1])),
                    constant_values=pad_val)
        return x.T                                   # [target_rows, bpad]

    q_r = rows(q_values, 0.0, A_PAD)                 # padded rows masked in-kernel
    p_r = rows(probabilities, 0.0, A_PAD)            # never rewarded on padding
    u_r = rows(u_reward, 1.0, A_PAD)                 # u < p always False on padding
    fb_r = rows(feedback.reshape(B, 1), 0.0, 1)
    ua_r = rows(u_action.reshape(B, 1), 0.0, 1)
    co_r = rows(correct_action.astype(jnp.float32).reshape(B, 1), 0.0, 1)
    zpad = jnp.zeros((ROWS - 3 * A_PAD - 3, bpad), jnp.float32)
    x = jnp.concatenate([q_r, p_r, u_r, fb_r, ua_r, co_r, zpad], axis=0)  # [32, bpad]

    kernel = functools.partial(
        _qlearning_kernel, n_actions=A, temperature=temperature,
        factual_lr=factual_lr, counterfactual_lr=counterfactual_lr,
        novel_value=novel_value, decay_factor=decay_factor)

    y = pl.pallas_call(
        kernel,
        grid=grid,
        in_specs=[pl.BlockSpec((ROWS, blk), lambda i: (0, i))],
        out_specs=pl.BlockSpec((ROWS, blk), lambda i: (0, i)),
        out_shape=jax.ShapeDtypeStruct((ROWS, bpad), jnp.float32),
        compiler_params=pltpu.CompilerParams(
            dimension_semantics=("parallel",)),      # trials independent -> v7x megacore
    )(x)

    return {
        "rewards": y[0:A, :B].T,
        "prediction_errors": y[8:8 + A, :B].T,
        "q_values": y[16:16 + A, :B].T,
        "action": y[24, :B].astype(jnp.int32),
        "accuracy": y[25, :B].astype(jnp.int32),
    }


def _reference(q, prob, fb, corr, urew, uact, T, flr, cflr, novel, decay):
    """Pure-JAX reference of the module's learning-phase forward."""
    rewards = (urew < prob).astype(jnp.float32) * fb[:, None]
    t = jnp.exp(q / T)
    denom = jnp.sum(t, axis=1, keepdims=True)
    cum = jnp.cumsum(t, axis=1)
    action = jnp.minimum(
        jnp.sum((cum < uact[:, None] * denom).astype(jnp.int32), axis=1),
        q.shape[1] - 1)
    accuracy = (action == corr).astype(jnp.int32)
    pe = rewards - q
    lane = jnp.arange(q.shape[1])[None, :]
    lr = jnp.where(lane == action[:, None], flr, cflr)
    q_new = q + lr * pe
    q_new = q_new + decay * (novel - q_new)
    return rewards, action, accuracy, pe, q_new


if __name__ == "__main__":
    B, A = 512, 4  # 512 trials, 4 stimuli/actions per trial
    key = jax.random.PRNGKey(0)
    k1, k2, k3, k4, k5, k6 = jax.random.split(key, 6)

    q_values = jax.random.uniform(k1, (B, A), jnp.float32, 0.0, 1.0)
    probabilities = jax.random.uniform(k2, (B, A), jnp.float32, 0.0, 1.0)
    feedback = jnp.where(jax.random.bernoulli(k3, 0.5, (B,)), 1.0, -1.0).astype(jnp.float32)
    correct_action = jax.random.randint(k4, (B,), 0, A)
    u_reward = jax.random.uniform(k5, (B, A), jnp.float32)
    u_action = jax.random.uniform(k6, (B,), jnp.float32)

    out = qlearning_step(q_values, probabilities, feedback, correct_action,
                         u_reward, u_action, block_trials=256)  # grid=(2,) at this size
    jax.block_until_ready(out)

    rewards_r, action_r, acc_r, pe_r, qnew_r = _reference(
        q_values, probabilities, feedback, correct_action, u_reward, u_action,
        TEMPERATURE, FACTUAL_LR, COUNTERFACTUAL_LR, NOVEL_VALUE, DECAY_FACTOR)

    assert out["action"].shape == (B,)
    assert out["q_values"].shape == (B, A)
    assert bool(jnp.all((out["action"] >= 0) & (out["action"] < A)))
    assert jnp.allclose(out["rewards"], rewards_r, atol=1e-6)
    assert jnp.allclose(out["prediction_errors"], pe_r, atol=1e-6)
    # accuracy and q-update consistent with the kernel's own sampled action
    assert bool(jnp.all(out["accuracy"] ==
                        (out["action"] == correct_action).astype(jnp.int32)))
    lane = jnp.arange(A)[None, :]
    lr = jnp.where(lane == out["action"][:, None], FACTUAL_LR, COUNTERFACTUAL_LR)
    qn = q_values + lr * pe_r
    qn = qn + DECAY_FACTOR * (NOVEL_VALUE - qn)
    assert jnp.allclose(out["q_values"], qn, atol=1e-5)
    # sampled actions should agree with the reference on (essentially) all trials
    match = float(jnp.mean((out["action"] == action_r).astype(jnp.float32)))
    assert match > 0.99, match
    print("KERNEL_OK")
</pallas_src>

<mosaic_0001>
module attributes {stable_mosaic.version = 11 : i64} {
  func.func @_qlearning_kernel(%arg0: i32, %arg1: memref<32x256xf32, #tpu.memory_space<vmem>>, %arg2: memref<32x256xf32, #tpu.memory_space<vmem>>) attributes {dimension_semantics = [#tpu.dimension_semantics<parallel>], iteration_bounds = array<i64: 2>, scalar_prefetch = 0 : i64, scratch_operands = 0 : i64, tpu.core_type = #tpu.core_type<tc>, window_params = [{transform_indices = @transform_0, window_bounds = array<i64: 32, 256>}, {transform_indices = @transform_1, window_bounds = array<i64: 32, 256>}]} {
    %c0 = arith.constant 0 : index
    %c0_0 = arith.constant 0 : index
    %0 = vector.load %arg1[%c0, %c0_0] : memref<32x256xf32, #tpu.memory_space<vmem>>, vector<8x256xf32>
    %c8 = arith.constant 8 : index
    %c0_1 = arith.constant 0 : index
    %1 = vector.load %arg1[%c8, %c0_1] : memref<32x256xf32, #tpu.memory_space<vmem>>, vector<8x256xf32>
    %c16 = arith.constant 16 : index
    %c0_2 = arith.constant 0 : index
    %2 = vector.load %arg1[%c16, %c0_2] : memref<32x256xf32, #tpu.memory_space<vmem>>, vector<8x256xf32>
    %c24 = arith.constant 24 : index
    %c0_3 = arith.constant 0 : index
    %3 = vector.load %arg1[%c24, %c0_3] : memref<32x256xf32, #tpu.memory_space<vmem>>, vector<8x256xf32>
    %4 = vector.extract_strided_slice %3 {offsets = [0, 0], sizes = [1, 256], strides = [1, 1]} : vector<8x256xf32> to vector<1x256xf32>
    %5 = vector.extract_strided_slice %3 {offsets = [1, 0], sizes = [1, 256], strides = [1, 1]} : vector<8x256xf32> to vector<1x256xf32>
    %6 = vector.extract_strided_slice %3 {offsets = [2, 0], sizes = [1, 256], strides = [1, 1]} : vector<8x256xf32> to vector<1x256xf32>
    %7 = tpu.iota {dimensions = array<i32: 0>} : vector<8x256xi32>
    %8 = arith.sitofp %7 : vector<8x256xi32> to vector<8x256xf32>
    %c4_i32 = arith.constant 4 : i32
    %9 = vector.broadcast %c4_i32 : i32 to vector<8x256xi32>
    %10 = arith.cmpi slt, %7, %9 : vector<8x256xi32>
    %11 = arith.cmpf olt, %2, %1 : vector<8x256xf32>
    %cst = arith.constant 1.000000e+00 : f32
    %cst_4 = arith.constant 0.000000e+00 : f32
    %12 = vector.broadcast %cst : f32 to vector<8x256xf32>
    %13 = vector.broadcast %cst_4 : f32 to vector<8x256xf32>
    %14 = arith.select %11, %12, %13 : vector<8x256xi1>, vector<8x256xf32>
    %15 = vector.broadcast %4 : vector<1x256xf32> to vector<8x256xf32>
    %16 = arith.mulf %14, %15 : vector<8x256xf32>
    %cst_5 = arith.constant 2.000000e+00 : f32
    %17 = vector.broadcast %cst_5 : f32 to vector<8x256xf32>
    %18 = arith.mulf %0, %17 : vector<8x256xf32>
    %19 = math.exp %18 : vector<8x256xf32>
    %cst_6 = arith.constant 0.000000e+00 : f32
    %20 = vector.broadcast %cst_6 : f32 to vector<8x256xf32>
    %21 = arith.select %10, %19, %20 : vector<8x256xi1>, vector<8x256xf32>
    %cst_7 = arith.constant dense<0.000000e+00> : vector<256xf32>
    %22 = vector.multi_reduction <add>, %21, %cst_7 [0] : vector<8x256xf32> to vector<256xf32>
    %23 = vector.shape_cast %22 : vector<256xf32> to vector<1x256xf32>
    %24 = arith.mulf %5, %23 : vector<1x256xf32>
    %25 = vector.extract_strided_slice %21 {offsets = [0, 0], sizes = [1, 256], strides = [1, 1]} : vector<8x256xf32> to vector<1x256xf32>
    %26 = arith.cmpf olt, %25, %24 : vector<1x256xf32>
    %cst_8 = arith.constant 1.000000e+00 : f32
    %cst_9 = arith.constant 0.000000e+00 : f32
    %27 = vector.broadcast %cst_8 : f32 to vector<1x256xf32>
    %28 = vector.broadcast %cst_9 : f32 to vector<1x256xf32>
    %29 = arith.select %26, %27, %28 : vector<1x256xi1>, vector<1x256xf32>
    %30 = vector.extract_strided_slice %21 {offsets = [1, 0], sizes = [1, 256], strides = [1, 1]} : vector<8x256xf32> to vector<1x256xf32>
    %31 = arith.addf %25, %30 : vector<1x256xf32>
    %32 = arith.cmpf olt, %31, %24 : vector<1x256xf32>
    %cst_10 = arith.constant 1.000000e+00 : f32
    %cst_11 = arith.constant 0.000000e+00 : f32
    %33 = vector.broadcast %cst_10 : f32 to vector<1x256xf32>
    %34 = vector.broadcast %cst_11 : f32 to vector<1x256xf32>
    %35 = arith.select %32, %33, %34 : vector<1x256xi1>, vector<1x256xf32>
    %36 = arith.addf %29, %35 : vector<1x256xf32>
    %37 = vector.extract_strided_slice %21 {offsets = [2, 0], sizes = [1, 256], strides = [1, 1]} : vector<8x256xf32> to vector<1x256xf32>
    %38 = arith.addf %31, %37 : vector<1x256xf32>
    %39 = arith.cmpf olt, %38, %24 : vector<1x256xf32>
    %cst_12 = arith.constant 1.000000e+00 : f32
    %cst_13 = arith.constant 0.000000e+00 : f32
    %40 = vector.broadcast %cst_12 : f32 to vector<1x256xf32>
    %41 = vector.broadcast %cst_13 : f32 to vector<1x256xf32>
    %42 = arith.select %39, %40, %41 : vector<1x256xi1>, vector<1x256xf32>
    %43 = arith.addf %36, %42 : vector<1x256xf32>
    %44 = vector.extract_strided_slice %21 {offsets = [3, 0], sizes = [1, 256], strides = [1, 1]} : vector<8x256xf32> to vector<1x256xf32>
    %45 = arith.addf %38, %44 : vector<1x256xf32>
    %46 = arith.cmpf olt, %45, %24 : vector<1x256xf32>
    %cst_14 = arith.constant 1.000000e+00 : f32
    %cst_15 = arith.constant 0.000000e+00 : f32
    %47 = vector.broadcast %cst_14 : f32 to vector<1x256xf32>
    %48 = vector.broadcast %cst_15 : f32 to vector<1x256xf32>
    %49 = arith.select %46, %47, %48 : vector<1x256xi1>, vector<1x256xf32>
    %50 = arith.addf %43, %49 : vector<1x256xf32>
    %cst_16 = arith.constant 3.000000e+00 : f32
    %51 = vector.broadcast %cst_16 : f32 to vector<1x256xf32>
    %52 = arith.minimumf %50, %51 : vector<1x256xf32>
    %53 = arith.cmpf oeq, %52, %6 : vector<1x256xf32>
    %cst_17 = arith.constant 1.000000e+00 : f32
    %cst_18 = arith.constant 0.000000e+00 : f32
    %54 = vector.broadcast %cst_17 : f32 to vector<1x256xf32>
    %55 = vector.broadcast %cst_18 : f32 to vector<1x256xf32>
    %56 = arith.select %53, %54, %55 : vector<1x256xi1>, vector<1x256xf32>
    %57 = arith.subf %16, %0 : vector<8x256xf32>
    %58 = vector.broadcast %52 : vector<1x256xf32> to vector<8x256xf32>
    %59 = arith.cmpf oeq, %8, %58 : vector<8x256xf32>
    %cst_19 = arith.constant 3.000000e-01 : f32
    %cst_20 = arith.constant 1.000000e-01 : f32
    %60 = vector.broadcast %cst_19 : f32 to vector<8x256xf32>
    %61 = vector.broadcast %cst_20 : f32 to vector<8x256xf32>
    %62 = arith.select %59, %60, %61 : vector<8x256xi1>, vector<8x256xf32>
    %63 = arith.mulf %62, %57 : vector<8x256xf32>
    %64 = arith.addf %0, %63 : vector<8x256xf32>
    %cst_21 = arith.constant 0.000000e+00 : f32
    %65 = vector.broadcast %cst_21 : f32 to vector<8x256xf32>
    %66 = arith.subf %65, %64 : vector<8x256xf32>
    %cst_22 = arith.constant 5.000000e-02 : f32
    %67 = vector.broadcast %cst_22 : f32 to vector<8x256xf32>
    %68 = arith.mulf %67, %66 : vector<8x256xf32>
    %69 = arith.addf %64, %68 : vector<8x256xf32>
    %c0_23 = arith.constant 0 : index
    %c0_24 = arith.constant 0 : index
    %70 = vector.load %arg2[%c0_23, %c0_24] : memref<32x256xf32, #tpu.memory_space<vmem>>, vector<8x256xf32>
    tpu.vector_store %arg2[%c0_23, %c0_24], %16 {strides = array<i32>} : memref<32x256xf32, #tpu.memory_space<vmem>>, vector<8x256xf32>,
    %c8_25 = arith.constant 8 : index
    %c0_26 = arith.constant 0 : index
    %71 = vector.load %arg2[%c8_25, %c0_26] : memref<32x256xf32, #tpu.memory_space<vmem>>, vector<8x256xf32>
    tpu.vector_store %arg2[%c8_25, %c0_26], %57 {strides = array<i32>} : memref<32x256xf32, #tpu.memory_space<vmem>>, vector<8x256xf32>,
    %c16_27 = arith.constant 16 : index
    %c0_28 = arith.constant 0 : index
    %72 = vector.load %arg2[%c16_27, %c0_28] : memref<32x256xf32, #tpu.memory_space<vmem>>, vector<8x256xf32>
    tpu.vector_store %arg2[%c16_27, %c0_28], %69 {strides = array<i32>} : memref<32x256xf32, #tpu.memory_space<vmem>>, vector<8x256xf32>,
    %cst_29 = arith.constant 0.000000e+00 : f32
    %73 = vector.broadcast %cst_29 : f32 to vector<8x256xf32>
    %74 = arith.cmpf oeq, %8, %73 : vector<8x256xf32>
    %cst_30 = arith.constant 0.000000e+00 : f32
    %75 = vector.shape_cast %52 : vector<1x256xf32> to vector<1x256xf32>
    %76 = vector.broadcast %75 : vector<1x256xf32> to vector<8x256xf32>
    %77 = vector.broadcast %cst_30 : f32 to vector<8x256xf32>
    %78 = arith.select %74, %76, %77 : vector<8x256xi1>, vector<8x256xf32>
    %cst_31 = arith.constant 1.000000e+00 : f32
    %79 = vector.broadcast %cst_31 : f32 to vector<8x256xf32>
    %80 = arith.cmpf oeq, %8, %79 : vector<8x256xf32>
    %cst_32 = arith.constant 0.000000e+00 : f32
    %81 = vector.shape_cast %56 : vector<1x256xf32> to vector<1x256xf32>
    %82 = vector.broadcast %81 : vector<1x256xf32> to vector<8x256xf32>
    %83 = vector.broadcast %cst_32 : f32 to vector<8x256xf32>
    %84 = arith.select %80, %82, %83 : vector<8x256xi1>, vector<8x256xf32>
    %85 = arith.addf %78, %84 : vector<8x256xf32>
    %c24_33 = arith.constant 24 : index
    %c0_34 = arith.constant 0 : index
    %86 = vector.load %arg2[%c24_33, %c0_34] : memref<32x256xf32, #tpu.memory_space<vmem>>, vector<8x256xf32>
    tpu.vector_store %arg2[%c24_33, %c0_34], %85 {strides = array<i32>} : memref<32x256xf32, #tpu.memory_space<vmem>>, vector<8x256xf32>,
    return
  }
  func.func @transform_0(%arg0: i32) -> (i32, i32) {
    %c0_i32 = arith.constant 0 : i32
    %c0_i32_0 = arith.constant 0 : i32
    return %c0_i32, %arg0 : i32, i32
  }
  func.func @transform_1(%arg0: i32) -> (i32, i32) {
    %c0_i32 = arith.constant 0 : i32
    %c0_i32_0 = arith.constant 0 : i32
    return %c0_i32, %arg0 : i32, i32
  }
}

</mosaic_0001>

<bundles_post_ra>
// kernel: tpu_custom_call.1
= control target key start
LH: loop header
LB: loop body
LE: loop exit
PB: predicated region body
PF: predicated region fallthrough
CT: control target
= control target key end

     0   :  { %6 = vsyncpa [#allocation3], 0  ;;  %s792_s0 = inlined_call_operand.hbm [shape: f32[32,512], index: 0, kind: input, shape index: {}]   ;;  %s793_s1 = inlined_call_operand.hbm [shape: f32[32,512], index: 1, kind: output, shape index: {}]  }
   0x1   :  { %8 = vsyncpa [#allocation3 + $0x1], 0 }
   0x2   :  { %9 = vsyncpa [#allocation4], 0 }
   0x3   :  { %11 = vsyncpa [#allocation4 + $0x1], 0  ;;  %s568_s6 = smov 0   ;;  %s570_s7 = smov 0  }
   0x4   :  { %s572_s8 = smov 0   ;;  %s574_s9 = smov 0  }
   0x5 LB: > { %s589_s10 = sadd.s32 4294967295, %s546_s9   ;;  %s380_s11 = sadd.s32 4294967294, %s546_s9   ;;  %s546_s9 = sphi %s574_s9, %s809_s9   ;;  %s542_s8 = sphi %s572_s8, %s808_s8   ;;  %s538_s7 = sphi %s570_s7, %s807_s7   ;;  %s534_s6 = sphi %s568_s6, %s806_s6  }
   0x6   : > { %s593_s12 = sadd.s32 1, %s546_s9   ;;  %s24_s13 = sadd.s32 1, %s542_s8 }
   0x7   : > { %s21_s14 = ssub.s32 %s546_s9, %s593_s12  ;;  %p31_p0 = scmp.ne.s32.totalorder %s542_s8, %s538_s7 }
   0x8   : > { %p22_p1 = scmp.eq.s32.totalorder %s21_s14, 0  ;;  %p32_p2 = scmp.eq.s32.totalorder %s546_s9, 0 }
   0x9   : > { %p37_p3 = scmp.ne.s32.totalorder %s538_s7, %s534_s6  ;;  %p38_p4 = scmp.eq.s32.totalorder %s589_s10, 0 }
   0xa   : > { %s605_s15 = scalar_select %p22_p1, %s542_s8, %s24_s13  }
   0xb   : > { %p607_p5 = por %p32_p2, %p31_p0  ;;  %p611_p6 = por %p38_p4, %p37_p3 }
   0xc   : > { %p61_p7 = scmp.eq.s32.totalorder %s589_s10, 1  ;;  %p67_p8 = scmp.eq.s32.totalorder %s380_s11, 1 }
   0xd   : > { %s797_s17 = scalar_select %p611_p6, 1, 0 }
   0xe   : > { %p408_p10 = scmp.lt.s32.totalorder %s546_s9, 2  ;;  %p618_p11 = por %p61_p7, %p31_p0 }
   0xf   : > { %p622_p12 = por %p67_p8, %p37_p3  ;;  %s87_s20 = sand.u32 1, %s542_s8  }
  0x10   : > { %s798_s18 = scalar_select %p618_p11, 1, 0 }
  0x11   : > { %s799_s19 = scalar_select %p622_p12, 1, 0 }
  0x12   : > { %s394_s21 = sshll.u32 %s546_s9, 8  ;;  %s383_s22 = sshll.u32 %s87_s20, 6 }
  0x13   : > { %s631_s25 = scalar_lea.hbm %s792_s0, %s394_s21  ;;  %s91_s26 = scalar_lea.vmem [#allocation2], %s383_s22 }
  0x14   : > { %s98_s27 = sshll.u32 %s91_s26, 4  ;;  %p635_p13 = pnand %p408_p10, %p607_p5  ;;  %s639_s27 = int_to_ptr.vmem [resolvable:$true] %s98_s27 }
  0x15   : > { %s642_s29 = scalar_lea.sflag [#allocation3], %s87_s20  ;;  %s454_s30 = scalar_lea.hbm %s631_s25, 1024 }
  0x16   : > { %p455_p1 = scmp.ne.s32.totalorder %s631_s25, %s454_s30  ;;  %p456_p2 = pneg %p635_p13 }
  0x17   : > { %s459_s4 = scalar_lea.hbm %s792_s0, 2048  ;;  %p460_p5 = scmp.lt.s32.totalorder %s631_s25, %s792_s0 }
  0x18   : > { %p457_p3 = pnand %p456_p2, %p455_p1  ;;  %p461_p7 = scmp.lt.s32.totalorder %s459_s4, %s454_s30 }
  0x1a   : > { %p458_p4 = pneg %p457_p3  ;;  %p462_p8 = por %p461_p7, %p460_p5 }
  0x1c   : > { %p463_p10 = pnand %p462_p8, %p458_p4 }
  0x1e   : > { %466 = shalt.err (!%p463_p10)
}
  0x1f   : > { %s467_s13 = scalar_lea.vmem %s639_s27, 1024  ;;  %s548_s14 = smov [#allocation2]  }
  0x20   : > { %p468_p9 = scmp.ne.s32.totalorder %s639_s27, %s467_s13  ;;  %s472_s16 = sshll.u32 %s548_s14, 4  ;;  %s473_s16 = int_to_ptr.vmem [resolvable:$false] %s472_s16 }
  0x21   : > { %s474_s20 = scalar_lea.vmem %s473_s16, 2048  ;;  %p475_p3 = scmp.lt.s32.totalorder %s639_s27, %s473_s16 }
  0x22   : > { %p470_p0 = pnand %p468_p9, %p456_p2  ;;  %p476_p12 = scmp.lt.s32.totalorder %s474_s20, %s467_s13 }
  0x24   : > { %p471_p1 = pneg %p470_p0  ;;  %p477_p11 = por %p476_p12, %p475_p3 }
  0x26   : > { %p478_p6 = pnand %p477_p11, %p471_p1 }
  0x28   : > { %481 = shalt.err (!%p478_p6)
}
  0x29   : > { %s549_s21 = smov 512   ;;  %s550_s22 = smov 256  }
  0x2a   : > { %s551_s23 = smov 16   ;;  %p106_p9 = scmp.lt.s32.totalorder %s546_s9, 3 }
  0x2b   : > { %403 = dma.hbm_to_vmem [thread:$0]  (!%p635_p13), %s631_s25, 1024, %s639_s27, %s642_s29, %s549_s21, %s550_s22, %s551_s23  }
  0x2c   : > { %p801_p0 = scmp.ge.s32.totalorder %s546_s9, 1 }
  0x2e   : > { %p107_p2 = pnand %p801_p0, %p106_p9 }
  0x2f   : > { %s667_s24 = sand.u32 (!%p107_p2), 1, %s538_s7   ;;  %p802_p6 = scmp.ne.s32.totalorder (!%p107_p2), %s797_s17, 0 }
  0x30   : > { %110 = sbr.rel (%p107_p2) target bundleno = 133 (0x85), region = 24  ;;  %s387_s26 = sshll.u32 (!%p107_p2), %s667_s24, 6 }
  0x31   : > { %s113_s30 = scalar_lea.sflag (!%p107_p2), [#allocation3], %s667_s24  ;;  %s116_s2 = scalar_lea.vmem (!%p107_p2), [#allocation2], %s387_s26 }
  0x35   : > { %525 = dma.done.wait (%p802_p6), %s113_s30, 1024  }
  0x36   : > { %527 = vsyncadd (%p802_p6), %s113_s30, 4294966272  ;;  %v145_v0 = vlaneseq  ;;  %v139_v3 = vld [vmem:[%s116_s2 + $0x10] sm:$0xff]  ;;  %v141_v4 = vld [vmem:[%s116_s2 + $0x20] sm:$0xff]  ;;  %v552_v10 = vmov 0.0   ;;  %s696_s17 = scalar_lea.vmem [#allocation5], %s387_s26  ;;  %s395_s27 = sshll.u32 %s589_s10, 8 }
  0x37   : > { %v680_v5 = vld [vmem:[%s116_s2 + $0x30] sm:$0xff]  ;;  %vm149_vm0 = vcmp.lt.f32.partialorder %v141_v4, %v139_v3  ;;  %v140_v7 = vld [vmem:[%s116_s2 + $0x18] sm:$0xff]  ;;  %v142_v8 = vld [vmem:[%s116_s2 + $0x28] sm:$0xff]  ;;  %s307_s25 = sshll.u32 %s696_s17, 4  ;;  %s748_s3 = scalar_lea.hbm %s793_s1, %s395_s27  ;;  %s742_s25 = int_to_ptr.vmem [resolvable:$true] %s307_s25 }
  0x38   : > { %v675_v1 = vshrl.u32 %v145_v0, 7  ;;  %v684_v9 = vld [vmem:[%s116_s2 + $0x38] sm:$0xff]  ;;  %v151_v11 = vsel %vm149_vm0, 1.0, %v552_v10  ;;  %vm150_vm1 = vcmp.lt.f32.partialorder %v142_v8, %v140_v7  ;;  %v689_v13 = vld [vmem:[%s116_s2] sm:$0xff]  ;;  %v691_v14 = vld [vmem:[%s116_s2 + $0x8] sm:$0xff]  ;;  %v237_v3 = vrot.slane %v680_v5, 2 }
  0x39   : > { %v152_v16 = vsel %vm150_vm1, 1.0, %v552_v10  ;;  %v163_v17 = vmul.f32 2.0, %v689_v13  ;;  %v164_v18 = vmul.f32 2.0, %v691_v14  ;;  %s294_s4 = scalar_lea.sflag [#allocation4], %s667_s24  ;;  %s482_s5 = scalar_lea.vmem %s742_s25, 1024 }
  0x3a   : > { %v678_v2 = vsub.s32 0, %v675_v1  ;;  %vm148_vm2 = vcmp.lt.s32.totalorder %v675_v1, 4  ;;  %v147_v7 = vcvt.s32.f32 %v675_v1  ;;  %p483_p11 = scmp.ne.s32.totalorder %s742_s25, %s482_s5  ;;  %p803_p12 = scmp.ne.s32.totalorder %s798_s18, 0 }
  0x3b   : > { %v165_v20 = vmul.f32 1.442695, %v163_v17  ;;  %v167_v22 = vmul.f32 1.442695, %v164_v18  ;;  %s554_s10 = smov [#allocation5]  }
  0x3c   : > { %v156_v6 = vrot.slane %v680_v5, %v678_v2  ;;  %v160_v12 = vrot.slane %v684_v9, %v678_v2  ;;  %vm275_vm11 = vcmp.eq.f32.partialorder %v147_v7, 0.0  ;;  %vm278_vm13 = vcmp.eq.f32.partialorder %v147_v7, 1.0  ;;  %p484_p13 = pnand %p483_p11, %p803_p12  ;;  %s486_s11 = sshll.u32 %s554_s10, 4  ;;  %s487_s11 = int_to_ptr.vmem [resolvable:$false] %s486_s11 }
  0x3d   : > { %450 = vpow2.f32 %v165_v20  ;;  %v553_v20 = vmov 0.1   ;;  %s488_s13 = scalar_lea.vmem %s487_s11, 2048  ;;  %p489_p5 = scmp.lt.s32.totalorder %s742_s25, %s487_s11 }
  0x3e   : > { %v161_v15 = vmul.f32 %v156_v6, %v151_v11  ;;  %v162_v19 = vmul.f32 %v160_v12, %v152_v16  ;;  %452 = vpow2.f32 %v167_v22  ;;  %p485_p4 = pneg %p484_p13  ;;  %p490_p7 = scmp.lt.s32.totalorder %s488_s13, %s482_s5 }
  0x40   : > { %269 = vst [vmem:[%s696_s17] sm:$0xff] %v161_v15  ;;  %v700_v21 = vsub.f32 %v161_v15, %v689_v13  ;;  %270 = vst [vmem:[%s696_s17 + $0x8] sm:$0xff] %v162_v19  ;;  %v704_v23 = vsub.f32 %v162_v19, %v691_v14  ;;  %v238_v15 = vrot.slane %v684_v9, 2  ;;  %p491_p8 = por %p490_p7, %p489_p5 }
  0x42   : > { %271 = vst [vmem:[%s696_s17 + $0x10] sm:$0xff] %v700_v21  ;;  %272 = vst [vmem:[%s696_s17 + $0x18] sm:$0xff] %v704_v23  ;;  %p492_p10 = pnand %p491_p8, %p485_p4 }
  0x4a   : > { %v451_v24 = vpop.eup %450 }
  0x4b   : > { %v453_v25 = vpop.eup %452  ;;  %v169_v26 = vsel %vm148_vm2, %v451_v24, 0.0 }
  0x4c   : > { %v171_v27 = vrot.slane %v169_v26, 4  ;;  %v197_v28 = vrot.slane %v169_v26, 1  ;;  %v170_v29 = vsel %vm148_vm2, %v453_v25, 0.0  ;;  %v209_v34 = vrot.slane %v169_v26, 2 }
  0x4d   : > { %v177_v31 = vrot.slane %v170_v29, 4  ;;  %v198_v36 = vrot.slane %v170_v29, 1  ;;  %v221_v41 = vrot.slane %v169_v26, 3  ;;  %v210_v44 = vrot.slane %v170_v29, 2 }
  0x4e   : > { %v172_v30 = vadd.f32 %v171_v27, %v169_v26  ;;  %v201_v33 = vadd.f32 %v197_v28, %v169_v26  ;;  %v222_v51 = vrot.slane %v170_v29, 3 }
  0x4f   : > { %v178_v35 = vadd.f32 %v177_v31, %v170_v29  ;;  %v202_v43 = vadd.f32 %v198_v36, %v170_v29 }
  0x50   : > { %v173_v32 = vrot.slane %v172_v30, 2  ;;  %v213_v40 = vadd.f32 %v209_v34, %v201_v33 }
  0x51   : > { %v179_v38 = vrot.slane %v178_v35, 2  ;;  %v214_v50 = vadd.f32 %v210_v44, %v202_v43 }
  0x52   : > { %v174_v37 = vadd.f32 %v173_v32, %v172_v30  ;;  %v225_v48 = vadd.f32 %v221_v41, %v213_v40 }
  0x53   : > { %v180_v42 = vadd.f32 %v179_v38, %v178_v35  ;;  %v226_v57 = vadd.f32 %v222_v51, %v214_v50 }
  0x54   : > { %v175_v39 = vrot.slane %v174_v37, 1 }
  0x55   : > { %v181_v46 = vrot.slane %v180_v42, 1 }
  0x56   : > { %v176_v45 = vadd.f32 %v175_v39, %v174_v37 }
  0x57   : > { %v182_v49 = vadd.f32 %v181_v46, %v180_v42 }
  0x58   : > { %v183_v47 = vmul.f32 %v176_v45, %v680_v5 }
  0x59   : > { %v184_v53 = vmul.f32 %v182_v49, %v684_v9 }
  0x5a   : > { %v187_v52 = vrot.slane %v183_v47, 1 }
  0x5b   : > { %v188_v59 = vrot.slane %v184_v53, 1 }
  0x5c   : > { %vm191_vm3 = vcmp.lt.f32.partialorder %v169_v26, %v187_v52  ;;  %vm203_vm4 = vcmp.lt.f32.partialorder %v201_v33, %v187_v52  ;;  %vm215_vm5 = vcmp.lt.f32.partialorder %v213_v40, %v187_v52  ;;  %vm227_vm6 = vcmp.lt.f32.partialorder %v225_v48, %v187_v52 }
  0x5d   : > { %v193_v54 = vsel %vm191_vm3, 1.0, %v552_v10  ;;  %v205_v55 = vsel %vm203_vm4, 1.0, %v552_v10  ;;  %v217_v56 = vsel %vm215_vm5, 1.0, %v552_v10  ;;  %v229_v60 = vsel %vm227_vm6, 1.0, %v552_v10 }
  0x5e   : > { %v207_v58 = vadd.f32 %v205_v55, %v193_v54  ;;  %vm192_vm7 = vcmp.lt.f32.partialorder %v170_v29, %v188_v59  ;;  %vm204_vm8 = vcmp.lt.f32.partialorder %v202_v43, %v188_v59  ;;  %vm216_vm9 = vcmp.lt.f32.partialorder %v214_v50, %v188_v59 }
  0x5f   : > { %v194_v62 = vsel %vm192_vm7, 1.0, %v552_v10  ;;  %v206_v63 = vsel %vm204_vm8, 1.0, %v552_v10  ;;  %v218_v0 = vsel %vm216_vm9, 1.0, %v552_v10  ;;  %vm228_vm10 = vcmp.lt.f32.partialorder %v226_v57, %v188_v59 }
  0x60   : > { %v219_v61 = vadd.f32 %v217_v56, %v207_v58  ;;  %v208_v6 = vadd.f32 %v206_v63, %v194_v62  ;;  %v230_v8 = vsel %vm228_vm10, 1.0, %v552_v10 }
  0x62   : > { %v231_v4 = vadd.f32 %v229_v60, %v219_v61  ;;  %v220_v12 = vadd.f32 %v218_v0, %v208_v6 }
  0x64   : > { %v233_v11 = vmin.f32 %v231_v4, 3.0  ;;  %v232_v17 = vadd.f32 %v230_v8, %v220_v12 }
  0x66   : > { %v250_v16 = vrot.slane %v233_v11, %v678_v2  ;;  %vm241_vm12 = vcmp.eq.f32.partialorder %v233_v11, %v237_v3  ;;  %v234_v5 = vmin.f32 %v232_v17, 3.0 }
  0x67   : > { %v243_v18 = vsel %vm241_vm12, 1.0, %v552_v10 }
  0x68   : > { %vm255_vm14 = vcmp.eq.f32.partialorder %v147_v7, %v250_v16  ;;  %v276_v19 = vsel %vm275_vm11, %v250_v16, 0.0  ;;  %v282_v1 = vrot.slane %v243_v18, %v678_v2  ;;  %v254_v9 = vrot.slane %v234_v5, %v678_v2 }
  0x69   : > { %v257_v22 = vsel %vm255_vm14, 0.3, %v553_v20  ;;  %vm242_vm15 = vcmp.eq.f32.partialorder %v234_v5, %v238_v15 }
  0x6a   : > { %v259_v24 = vmul.f32 %v257_v22, %v700_v21  ;;  %v287_v25 = vsel %vm278_vm13, %v282_v1, 0.0  ;;  %v244_v27 = vsel %vm242_vm15, 1.0, %v552_v10  ;;  %vm256_vm0 = vcmp.eq.f32.partialorder %v147_v7, %v254_v9 }
  0x6b   : > { %v289_v26 = vadd.f32 %v287_v25, %v276_v19  ;;  %v277_v29 = vsel %vm275_vm11, %v254_v9, 0.0  ;;  %v286_v30 = vrot.slane %v244_v27, %v678_v2  ;;  %v258_v21 = vsel %vm256_vm0, 0.3, %v553_v20 }
  0x6c   : > { %v261_v28 = vadd.f32 %v259_v24, %v689_v13  ;;  %v260_v31 = vmul.f32 %v258_v21, %v704_v23 }
  0x6d   : > { %291 = vst [vmem:[%s696_s17 + $0x30] sm:$0xff] %v289_v26  ;;  %v288_v33 = vsel %vm278_vm13, %v286_v30, 0.0 }
  0x6e   : > { %v263_v32 = vsub.f32 0.0, %v261_v28  ;;  %v290_v34 = vadd.f32 %v288_v33, %v277_v29  ;;  %v262_v35 = vadd.f32 %v260_v31, %v691_v14 }
  0x70   : > { %v265_v10 = vmul.f32 0.05, %v263_v32  ;;  %292 = vst [vmem:[%s696_s17 + $0x38] sm:$0xff] %v290_v34  ;;  %v264_v36 = vsub.f32 0.0, %v262_v35 }
  0x72   : > { %v267_v13 = vadd.f32 %v265_v10, %v261_v28  ;;  %v266_v2 = vmul.f32 0.05, %v264_v36 }
  0x74   : > { %273 = vst [vmem:[%s696_s17 + $0x20] sm:$0xff] %v267_v13  ;;  %v268_v23 = vadd.f32 %v266_v2, %v262_v35 }
  0x76   : > { %274 = vst [vmem:[%s696_s17 + $0x28] sm:$0xff] %v268_v23 }
  0x77   : > { %495 = shalt.err (!%p492_p10)
}
  0x78   : > { %s496_s14 = scalar_lea.hbm %s748_s3, 1024  ;;  %s500_s21 = scalar_lea.hbm %s793_s1, 2048 }
  0x79   : > { %p497_p1 = scmp.ne.s32.totalorder %s748_s3, %s496_s14  ;;  %p501_p0 = scmp.lt.s32.totalorder %s748_s3, %s793_s1 }
  0x7a   : > { %p502_p2 = scmp.lt.s32.totalorder %s500_s21, %s496_s14 }
  0x7b   : > { %p498_p3 = pnand %p497_p1, %p803_p12 }
  0x7c   : > { %p503_p6 = por %p502_p2, %p501_p0 }
  0x7d   : > { %p499_p9 = pneg %p498_p3 }
  0x7f   : > { %p504_p11 = pnand %p503_p6, %p499_p9 }
  0x81   : > { %507 = shalt.err (!%p504_p11)
}
  0x82   : > { %s555_s26 = smov 256   ;;  %s556_s30 = smov 512  }
  0x83   : > { %s557_s2 = smov 16  }
  0x84   : > { %398 = dma.vmem_to_hbm [thread:$0]  (%p803_p12), %s742_s25, 1024, %s748_s3, %s294_s4, %s555_s26, %s556_s30, %s557_s2  }
  0x85 PF: > { %s322_s17 = sand.u32 1, %s534_s6   ;;  %p804_p13 = scmp.ne.s32.totalorder %s799_s19, 0 }
  0x86   : > { %p805_p4 = scmp.ge.s32.totalorder %s546_s9, 2  ;;  %s323_s27 = scalar_lea.sflag [#allocation4], %s322_s17 }
  0x88   : > { %p405_p5 = pnand %p805_p4, %p804_p13 }
  0x8a   : > { %p406_p7 = pneg %p405_p5 }
  0x8c   : > { %529 = dma.done.wait (%p406_p7), %s323_s27, 1024  }
  0x8d   : > { %531 = vsyncadd (%p406_p7), %s323_s27, 4294966272  ;;  %p14_p8 = scmp.ge.s32.totalorder %s593_s12, 4   ;;  %s806_s6 = smov %s538_s7 }
  0x8e   : > { %s807_s7 = smov %s542_s8  ;;  %s808_s8 = smov %s605_s15 }
  0x8f   : > { %s809_s9 = smov %s593_s12  ;;  %16 = sbr.rel (!%p14_p8) target bundleno = 5 (0x5), region = 69 }
  0x94   :  { %328 = vsyncpa [#allocation3], 1 }
  0x95   :  { %330 = vsyncpa [#allocation3 + $0x1], 1 }
  0x96   :  { %331 = vsyncpa [#allocation4], 1 }
  0x97   :  { %333 = vsyncpa [#allocation4 + $0x1], 1 }

</bundles_post_ra>
